<compile_context>
chip_gen: v6e
topology: v6e:2x2x1
jax: 0.10.0
libtpu: 0.0.40
codegen_flags: <defaults>
</compile_context>

<pallas_src>
import functools

import jax
import jax.numpy as jnp
from jax.experimental import pallas as pl
from jax.experimental.pallas import tpu as pltpu

_LANE = 128  # lane-padded latent width


def _round_up(a, m):
    return (a + m - 1) // m * m


def _svae_kernel(
    x_ref,                      # (TB, Din) f32
    ew1_ref, eb1_ref,           # (Din, H) bf16, (1, H) f32
    ew2_ref, eb2_ref,           # (H, E) f32,    (1, E) f32
    wmu_ref, bmu_ref,           # (E, LP) f32,   (1, LP) f32   (zero-padded past L)
    wk_ref, bk_ref,             # (1, E) f32,    (1, 1) f32
    dw1_ref, db1_ref,           # (LP, H) f32,   (1, H) f32    (zero rows past L)
    dw2_ref, db2_ref,           # (H, Din) bf16, (1, Din) f32
    e1_ref,                     # (1, LP) f32    basis vector e1 (hoisted constant)
    kidx_ref,                   # (1, K) f32     lane indices 0..K-1 (hoisted)
    beta_ref,                   # (TB, K)  Beta((L-1)/2,(L-1)/2) proposals
    unif_ref,                   # (TB, K)  Uniform(0,1) acceptance draws
    vnoise_ref,                 # (TB, LP) std normal, lane 0 and lanes>=L pre-zeroed
    xhat_ref,                   # out: (TB, Din) f32
    z_ref,                      # out: (TB, LP) f32  (lanes >= L are zero)
    *,
    latent_dim,
):
    f32 = jnp.float32
    bf16 = jnp.bfloat16
    x = x_ref[...]

    # ---------------- encoder ----------------
    h = jnp.dot(x.astype(bf16), ew1_ref[...],
                preferred_element_type=f32) + eb1_ref[...]
    h = jnp.maximum(h, 0.0)
    enc = jnp.dot(h, ew2_ref[...], preferred_element_type=f32) + eb2_ref[...]
    enc = jnp.maximum(enc, 0.0)

    # ---------------- encode(): mu, kappa ----------------
    mu_raw = jnp.dot(enc, wmu_ref[...], preferred_element_type=f32) + bmu_ref[...]
    mu = mu_raw * jax.lax.rsqrt(
        jnp.sum(mu_raw * mu_raw, axis=-1, keepdims=True) + 1e-12)

    # kappa head is N=1: keep it off the MXU (VPU mul + lane reduce)
    k_lin = jnp.sum(enc * wk_ref[...], axis=-1, keepdims=True) + bk_ref[...]
    softplus = jnp.maximum(k_lin, 0.0) + jnp.log1p(jnp.exp(-jnp.abs(k_lin)))
    kappa = softplus + 1.0                                        # (TB, 1)

    # ---------------- vMF rsample (Wood 1994, reparameterized) ----------------
    mm1 = jnp.float32(latent_dim - 1)
    inv_mm1 = jnp.float32(1.0 / (latent_dim - 1))
    sq = jnp.sqrt(4.0 * kappa * kappa + mm1 * mm1)
    b_ = (sq - 2.0 * kappa) * inv_mm1
    a_ = (mm1 + 2.0 * kappa + sq) * 0.25
    d_ = 4.0 * a_ * b_ * pl.reciprocal(1.0 + b_, approx=True) - mm1 * jnp.log(mm1)

    eps = beta_ref[...]                                           # (TB, K)
    u = unif_ref[...]                                             # (TB, K)
    inv_den = pl.reciprocal(1.0 - (1.0 - b_) * eps, approx=True)
    w_prop = (1.0 - (1.0 + b_) * eps) * inv_den
    t = 2.0 * a_ * b_ * inv_den
    accept = (mm1 * jnp.log(t) - t + d_) >= jnp.log(u)            # (TB, K) bool

    # "first accepted proposal" via lane min-reduce (VPU/XLU only, no MXU):
    kbig = jnp.float32(kidx_ref.shape[-1])
    score = jnp.where(accept, kidx_ref[...], kbig)                # (TB, K)
    min_idx = jnp.min(score, axis=-1, keepdims=True)              # (TB, 1)
    first = (score == min_idx).astype(f32) * accept.astype(f32)   # one-hot / zeros
    any_acc = (min_idx < kbig).astype(f32)
    w_sel = jnp.sum(w_prop * first, axis=-1, keepdims=True)
    w = w_sel * any_acc + w_prop[:, 0:1] * (1.0 - any_acc)        # (TB, 1)
    w = jnp.clip(w, -1.0, 1.0)
    # TODO(synk): true vMF sampling uses an unbounded rejection loop; here we
    # use K fixed proposals and take the first accepted (fallback: proposal 0).

    # tangent direction: uniform on the (L-1)-sphere orthogonal to e1
    e1 = e1_ref[...]                                              # (1, LP)
    vno = vnoise_ref[...]                                         # lane 0 pre-zeroed
    v = vno * jax.lax.rsqrt(jnp.sum(vno * vno, axis=-1, keepdims=True) + 1e-12)
    s = jnp.sqrt(jnp.maximum((1.0 - w) * (1.0 + w), 0.0))
    z_prime = w * e1 + s * v                                      # (TB, LP)

    # Householder reflection mapping e1 -> mu
    uvec = e1 - mu
    uhat = uvec * jax.lax.rsqrt(
        jnp.sum(uvec * uvec, axis=-1, keepdims=True) + 1e-12)
    z = z_prime - 2.0 * jnp.sum(uhat * z_prime, axis=-1, keepdims=True) * uhat

    # ---------------- decoder ----------------
    dh = jnp.maximum(
        jnp.dot(z, dw1_ref[...], preferred_element_type=f32) + db1_ref[...], 0.0)
    x_hat = jnp.dot(dh.astype(bf16), dw2_ref[...],
                    preferred_element_type=f32) + db2_ref[...]

    xhat_ref[...] = x_hat
    z_ref[...] = z


def svae_forward(x_nchw, params, noise, *, latent_dim, block_b=None):
    """forward(x) -> (x_hat, z).  x_nchw: [B, C, H, W] float32."""
    B, C, H, W = x_nchw.shape
    Din = C * H * W
    L = latent_dim
    LP = _LANE
    K = noise["beta"].shape[-1]
    E = params["wmu"].shape[0]

    x_flat = x_nchw.reshape(B, Din).astype(jnp.float32)

    # batch tile: multiple of 8 sublanes, capped at 128 rows per step
    TB = block_b if block_b is not None else min(128, _round_up(B, 8))
    Bp = _round_up(B, TB)
    pad_b = Bp - B

    x_p = jnp.pad(x_flat, ((0, pad_b), (0, 0)))
    beta_p = jnp.pad(noise["beta"].astype(jnp.float32),
                     ((0, pad_b), (0, 0)), constant_values=0.5)
    unif_p = jnp.pad(noise["unif"].astype(jnp.float32),
                     ((0, pad_b), (0, 0)), constant_values=0.5)
    # pre-zero lane 0 of the tangent noise and lane-pad latent dim to 128
    lane_mask = (jnp.arange(L) != 0).astype(jnp.float32)[None, :]
    vn_p = jnp.pad(noise["vnoise"].astype(jnp.float32) * lane_mask,
                   ((0, pad_b), (0, LP - L)))

    # weights: lane-pad latent-sized matrices, bf16 for the two Din-sized ones
    ew1 = params["ew1"].astype(jnp.bfloat16)
    dw2 = params["dw2"].astype(jnp.bfloat16)
    wmu_p = jnp.pad(params["wmu"], ((0, 0), (0, LP - L)))
    bmu_p = jnp.pad(params["bmu"], ((0, 0), (0, LP - L)))
    dw1_p = jnp.pad(params["dw1"], ((0, LP - L), (0, 0)))
    wk_row = params["wk"].reshape(1, E)
    e1_row = jnp.zeros((1, LP), jnp.float32).at[0, 0].set(1.0)
    kidx = jnp.arange(K, dtype=jnp.float32).reshape(1, K)

    inputs = (
        x_p,
        ew1, params["eb1"],
        params["ew2"], params["eb2"],
        wmu_p, bmu_p,
        wk_row, params["bk"],
        dw1_p, params["db1"],
        dw2, params["db2"],
        e1_row, kidx,
        beta_p, unif_p, vn_p,
    )

    def const_spec(arr):
        shape = arr.shape
        return pl.BlockSpec(shape, lambda i, _n=len(shape): (0,) * _n)

    def row_spec(ncols):
        return pl.BlockSpec((TB, ncols), lambda i: (i, 0))

    in_specs = [
        row_spec(Din),
        const_spec(ew1), const_spec(params["eb1"]),
        const_spec(params["ew2"]), const_spec(params["eb2"]),
        const_spec(wmu_p), const_spec(bmu_p),
        const_spec(wk_row), const_spec(params["bk"]),
        const_spec(dw1_p), const_spec(params["db1"]),
        const_spec(dw2), const_spec(params["db2"]),
        const_spec(e1_row), const_spec(kidx),
        row_spec(K), row_spec(K), row_spec(LP),
    ]
    out_specs = (row_spec(Din), row_spec(LP))

    # conservative VMEM budget from the actual working set (never 64 MiB flat)
    weight_bytes = sum(int(a.size) * a.dtype.itemsize for a in inputs[1:15])
    tile_bytes = (TB * Din * 4) * 2 + (TB * K * 4) * 2 + (TB * LP * 4) * 2
    vmem_est = 2 * (weight_bytes + tile_bytes) + (2 << 20)
    vmem_limit = int(min(max(vmem_est, 4 << 20), 48 << 20))

    kernel = functools.partial(_svae_kernel, latent_dim=L)
    x_hat_p, z_p = pl.pallas_call(
        kernel,
        out_shape=(
            jax.ShapeDtypeStruct((Bp, Din), jnp.float32),
            jax.ShapeDtypeStruct((Bp, LP), jnp.float32),
        ),
        grid=(Bp // TB,),
        in_specs=in_specs,
        out_specs=out_specs,
        compiler_params=pltpu.CompilerParams(
            dimension_semantics=("parallel",),
            vmem_limit_bytes=vmem_limit),
    )(*inputs)

    x_hat = x_hat_p[:B].reshape(B, C, H, W)
    z = z_p[:B, :L]
    return x_hat, z


def make_params(key, din, hidden, out_dim, latent):
    ks = jax.random.split(key, 12)

    def lin(kw, kb, fan_in, fan_out):
        bound = 1.0 / jnp.sqrt(jnp.float32(fan_in))
        w = jax.random.uniform(kw, (fan_in, fan_out), jnp.float32, -bound, bound)
        b = jax.random.uniform(kb, (1, fan_out), jnp.float32, -bound, bound)
        return w, b

    ew1, eb1 = lin(ks[0], ks[1], din, hidden)
    ew2, eb2 = lin(ks[2], ks[3], hidden, out_dim)
    wmu, bmu = lin(ks[4], ks[5], out_dim, latent)
    wk, bk = lin(ks[6], ks[7], out_dim, 1)
    dw1, db1 = lin(ks[8], ks[9], latent, hidden)
    dw2, db2 = lin(ks[10], ks[11], hidden, din)
    return dict(ew1=ew1, eb1=eb1, ew2=ew2, eb2=eb2, wmu=wmu, bmu=bmu,
                wk=wk, bk=bk, dw1=dw1, db1=db1, dw2=dw2, db2=db2)


if __name__ == "__main__":
    B, C, H, W = 2, 4, 16, 16
    HIDDEN, OUT_DIM, LATENT, K_PROP = 32, 32, 8, 16
    Din = C * H * W

    root = jax.random.PRNGKey(0)
    k_x, k_p, k_beta, k_unif, k_v = jax.random.split(root, 5)

    x = jax.random.normal(k_x, (B, C, H, W), jnp.float32)
    params = make_params(k_p, Din, HIDDEN, OUT_DIM, LATENT)
    noise = dict(
        beta=jax.random.beta(k_beta, (LATENT - 1) / 2.0, (LATENT - 1) / 2.0,
                             (B, K_PROP), jnp.float32),
        unif=jax.random.uniform(k_unif, (B, K_PROP), jnp.float32,
                                minval=1e-6, maxval=1.0),
        vnoise=jax.random.normal(k_v, (B, LATENT), jnp.float32),
    )

    fwd = jax.jit(functools.partial(svae_forward, latent_dim=LATENT))
    x_hat, z = fwd(x, params, noise)
    jax.block_until_ready((x_hat, z))

    assert x_hat.shape == (B, C, H, W)
    assert z.shape == (B, LATENT)
    # z must lie on the unit hypersphere (vMF sample)
    assert bool(jnp.all(jnp.abs(jnp.sum(z * z, axis=-1) - 1.0) < 1e-3))
    print("KERNEL_OK")
</pallas_src>

<mosaic_0001>
module attributes {stable_mosaic.version = 11 : i64} {
  func.func @_svae_kernel(%arg0: i32, %arg1: memref<8x1024xf32, #tpu.memory_space<vmem>>, %arg2: memref<1024x32xbf16, #tpu.memory_space<vmem>>, %arg3: memref<1x32xf32, #tpu.memory_space<vmem>>, %arg4: memref<32x32xf32, #tpu.memory_space<vmem>>, %arg5: memref<1x32xf32, #tpu.memory_space<vmem>>, %arg6: memref<32x128xf32, #tpu.memory_space<vmem>>, %arg7: memref<1x128xf32, #tpu.memory_space<vmem>>, %arg8: memref<1x32xf32, #tpu.memory_space<vmem>>, %arg9: memref<1x1xf32, #tpu.memory_space<vmem>>, %arg10: memref<128x32xf32, #tpu.memory_space<vmem>>, %arg11: memref<1x32xf32, #tpu.memory_space<vmem>>, %arg12: memref<32x1024xbf16, #tpu.memory_space<vmem>>, %arg13: memref<1x1024xf32, #tpu.memory_space<vmem>>, %arg14: memref<1x128xf32, #tpu.memory_space<vmem>>, %arg15: memref<1x16xf32, #tpu.memory_space<vmem>>, %arg16: memref<8x16xf32, #tpu.memory_space<vmem>>, %arg17: memref<8x16xf32, #tpu.memory_space<vmem>>, %arg18: memref<8x128xf32, #tpu.memory_space<vmem>>, %arg19: memref<8x1024xf32, #tpu.memory_space<vmem>>, %arg20: memref<8x128xf32, #tpu.memory_space<vmem>>) attributes {dimension_semantics = [#tpu.dimension_semantics<parallel>], iteration_bounds = array<i64: 1>, scalar_prefetch = 0 : i64, scratch_operands = 0 : i64, tpu.core_type = #tpu.core_type<tc>, window_params = [{transform_indices = @transform_0, window_bounds = array<i64: 8, 1024>}, {pipeline_mode = #tpu.pipeline_mode<synchronous>, transform_indices = @transform_1, window_bounds = array<i64: 1024, 32>}, {pipeline_mode = #tpu.pipeline_mode<synchronous>, transform_indices = @transform_2, window_bounds = array<i64: 1, 32>}, {pipeline_mode = #tpu.pipeline_mode<synchronous>, transform_indices = @transform_3, window_bounds = array<i64: 32, 32>}, {pipeline_mode = #tpu.pipeline_mode<synchronous>, transform_indices = @transform_4, window_bounds = array<i64: 1, 32>}, {pipeline_mode = #tpu.pipeline_mode<synchronous>, transform_indices = @transform_5, window_bounds = array<i64: 32, 128>}, {pipeline_mode = #tpu.pipeline_mode<synchronous>, transform_indices = @transform_6, window_bounds = array<i64: 1, 128>}, {pipeline_mode = #tpu.pipeline_mode<synchronous>, transform_indices = @transform_7, window_bounds = array<i64: 1, 32>}, {pipeline_mode = #tpu.pipeline_mode<synchronous>, transform_indices = @transform_8, window_bounds = array<i64: 1, 1>}, {pipeline_mode = #tpu.pipeline_mode<synchronous>, transform_indices = @transform_9, window_bounds = array<i64: 128, 32>}, {pipeline_mode = #tpu.pipeline_mode<synchronous>, transform_indices = @transform_10, window_bounds = array<i64: 1, 32>}, {pipeline_mode = #tpu.pipeline_mode<synchronous>, transform_indices = @transform_11, window_bounds = array<i64: 32, 1024>}, {pipeline_mode = #tpu.pipeline_mode<synchronous>, transform_indices = @transform_12, window_bounds = array<i64: 1, 1024>}, {pipeline_mode = #tpu.pipeline_mode<synchronous>, transform_indices = @transform_13, window_bounds = array<i64: 1, 128>}, {pipeline_mode = #tpu.pipeline_mode<synchronous>, transform_indices = @transform_14, window_bounds = array<i64: 1, 16>}, {transform_indices = @transform_15, window_bounds = array<i64: 8, 16>}, {transform_indices = @transform_16, window_bounds = array<i64: 8, 16>}, {transform_indices = @transform_17, window_bounds = array<i64: 8, 128>}, {transform_indices = @transform_18, window_bounds = array<i64: 8, 1024>}, {transform_indices = @transform_19, window_bounds = array<i64: 8, 128>}]} {
    %c0 = arith.constant 0 : index
    %c0_0 = arith.constant 0 : index
    %0 = vector.load %arg1[%c0, %c0_0] : memref<8x1024xf32, #tpu.memory_space<vmem>>, vector<8x1024xf32>
    %1 = arith.truncf %0 : vector<8x1024xf32> to vector<8x1024xbf16>
    %c0_1 = arith.constant 0 : index
    %c0_2 = arith.constant 0 : index
    %2 = vector.load %arg2[%c0_1, %c0_2] : memref<1024x32xbf16, #tpu.memory_space<vmem>>, vector<1024x32xbf16>
    %cst = arith.constant dense<0.000000e+00> : vector<8x32xf32>
    %3 = tpu.matmul %1, %2, %cst {dimension_numbers = #tpu.dot_dimension_numbers<[1], [0], [0], [1], [0, 0, 1, 1], [], []>} : vector<8x1024xbf16>, vector<1024x32xbf16>, vector<8x32xf32> -> vector<8x32xf32>
    %c0_3 = arith.constant 0 : index
    %c0_4 = arith.constant 0 : index
    %4 = vector.load %arg3[%c0_3, %c0_4] : memref<1x32xf32, #tpu.memory_space<vmem>>, vector<1x32xf32>
    %5 = vector.broadcast %4 : vector<1x32xf32> to vector<8x32xf32>
    %6 = arith.addf %3, %5 : vector<8x32xf32>
    %cst_5 = arith.constant 0.000000e+00 : f32
    %7 = vector.broadcast %cst_5 : f32 to vector<8x32xf32>
    %8 = arith.maximumf %6, %7 : vector<8x32xf32>
    %c0_6 = arith.constant 0 : index
    %c0_7 = arith.constant 0 : index
    %9 = vector.load %arg4[%c0_6, %c0_7] : memref<32x32xf32, #tpu.memory_space<vmem>>, vector<32x32xf32>
    %cst_8 = arith.constant dense<0.000000e+00> : vector<8x32xf32>
    %10 = tpu.matmul %8, %9, %cst_8 {dimension_numbers = #tpu.dot_dimension_numbers<[1], [0], [0], [1], [0, 0, 1, 1], [], []>} : vector<8x32xf32>, vector<32x32xf32>, vector<8x32xf32> -> vector<8x32xf32>
    %c0_9 = arith.constant 0 : index
    %c0_10 = arith.constant 0 : index
    %11 = vector.load %arg5[%c0_9, %c0_10] : memref<1x32xf32, #tpu.memory_space<vmem>>, vector<1x32xf32>
    %12 = vector.broadcast %11 : vector<1x32xf32> to vector<8x32xf32>
    %13 = arith.addf %10, %12 : vector<8x32xf32>
    %cst_11 = arith.constant 0.000000e+00 : f32
    %14 = vector.broadcast %cst_11 : f32 to vector<8x32xf32>
    %15 = arith.maximumf %13, %14 : vector<8x32xf32>
    %c0_12 = arith.constant 0 : index
    %c0_13 = arith.constant 0 : index
    %16 = vector.load %arg6[%c0_12, %c0_13] : memref<32x128xf32, #tpu.memory_space<vmem>>, vector<32x128xf32>
    %cst_14 = arith.constant dense<0.000000e+00> : vector<8x128xf32>
    %17 = tpu.matmul %15, %16, %cst_14 {dimension_numbers = #tpu.dot_dimension_numbers<[1], [0], [0], [1], [0, 0, 1, 1], [], []>} : vector<8x32xf32>, vector<32x128xf32>, vector<8x128xf32> -> vector<8x128xf32>
    %c0_15 = arith.constant 0 : index
    %c0_16 = arith.constant 0 : index
    %18 = vector.load %arg7[%c0_15, %c0_16] : memref<1x128xf32, #tpu.memory_space<vmem>>, vector<1x128xf32>
    %19 = vector.broadcast %18 : vector<1x128xf32> to vector<8x128xf32>
    %20 = arith.addf %17, %19 : vector<8x128xf32>
    %21 = arith.mulf %20, %20 : vector<8x128xf32>
    %cst_17 = arith.constant dense<0.000000e+00> : vector<8xf32>
    %22 = vector.multi_reduction <add>, %21, %cst_17 [1] : vector<8x128xf32> to vector<8xf32>
    %23 = vector.shape_cast %22 : vector<8xf32> to vector<8x1xf32>
    %cst_18 = arith.constant 9.99999996E-13 : f32
    %24 = vector.broadcast %cst_18 : f32 to vector<8x1xf32>
    %25 = arith.addf %23, %24 : vector<8x1xf32>
    %26 = math.rsqrt %25 : vector<8x1xf32>
    %27 = vector.broadcast %26 : vector<8x1xf32> to vector<8x128xf32>
    %28 = arith.mulf %20, %27 : vector<8x128xf32>
    %c0_19 = arith.constant 0 : index
    %c0_20 = arith.constant 0 : index
    %29 = vector.load %arg8[%c0_19, %c0_20] : memref<1x32xf32, #tpu.memory_space<vmem>>, vector<1x32xf32>
    %30 = vector.broadcast %29 : vector<1x32xf32> to vector<8x32xf32>
    %31 = arith.mulf %15, %30 : vector<8x32xf32>
    %cst_21 = arith.constant dense<0.000000e+00> : vector<8xf32>
    %32 = vector.multi_reduction <add>, %31, %cst_21 [1] : vector<8x32xf32> to vector<8xf32>
    %33 = vector.shape_cast %32 : vector<8xf32> to vector<8x1xf32>
    %c0_22 = arith.constant 0 : index
    %c0_23 = arith.constant 0 : index
    %34 = vector.load %arg9[%c0_22, %c0_23] : memref<1x1xf32, #tpu.memory_space<vmem>>, vector<1x1xf32>
    %35 = vector.broadcast %34 : vector<1x1xf32> to vector<8x1xf32>
    %36 = arith.addf %33, %35 : vector<8x1xf32>
    %cst_24 = arith.constant 0.000000e+00 : f32
    %37 = vector.broadcast %cst_24 : f32 to vector<8x1xf32>
    %38 = arith.maximumf %36, %37 : vector<8x1xf32>
    %39 = math.absf %36 : vector<8x1xf32>
    %cst_25 = arith.constant 0.000000e+00 : f32
    %40 = vector.broadcast %cst_25 : f32 to vector<8x1xf32>
    %41 = arith.subf %40, %39 : vector<8x1xf32>
    %42 = math.exp %41 : vector<8x1xf32>
    %43 = math.log1p %42 : vector<8x1xf32>
    %44 = arith.addf %38, %43 : vector<8x1xf32>
    %cst_26 = arith.constant 1.000000e+00 : f32
    %45 = vector.broadcast %cst_26 : f32 to vector<8x1xf32>
    %46 = arith.addf %44, %45 : vector<8x1xf32>
    %cst_27 = arith.constant 4.000000e+00 : f32
    %47 = vector.broadcast %cst_27 : f32 to vector<8x1xf32>
    %48 = arith.mulf %47, %46 : vector<8x1xf32>
    %49 = arith.mulf %48, %46 : vector<8x1xf32>
    %cst_28 = arith.constant 7.000000e+00 : f32
    %cst_29 = arith.constant 7.000000e+00 : f32
    %50 = arith.mulf %cst_28, %cst_29 : f32
    %51 = vector.broadcast %50 : f32 to vector<8x1xf32>
    %52 = arith.addf %49, %51 : vector<8x1xf32>
    %53 = math.sqrt %52 : vector<8x1xf32>
    %cst_30 = arith.constant 2.000000e+00 : f32
    %54 = vector.broadcast %cst_30 : f32 to vector<8x1xf32>
    %55 = arith.mulf %54, %46 : vector<8x1xf32>
    %56 = arith.subf %53, %55 : vector<8x1xf32>
    %cst_31 = arith.constant 0.142857149 : f32
    %57 = vector.broadcast %cst_31 : f32 to vector<8x1xf32>
    %58 = arith.mulf %56, %57 : vector<8x1xf32>
    %cst_32 = arith.constant 2.000000e+00 : f32
    %59 = vector.broadcast %cst_32 : f32 to vector<8x1xf32>
    %60 = arith.mulf %59, %46 : vector<8x1xf32>
    %cst_33 = arith.constant 7.000000e+00 : f32
    %61 = vector.broadcast %cst_33 : f32 to vector<8x1xf32>
    %62 = arith.addf %61, %60 : vector<8x1xf32>
    %63 = arith.addf %62, %53 : vector<8x1xf32>
    %cst_34 = arith.constant 2.500000e-01 : f32
    %64 = vector.broadcast %cst_34 : f32 to vector<8x1xf32>
    %65 = arith.mulf %63, %64 : vector<8x1xf32>
    %cst_35 = arith.constant 4.000000e+00 : f32
    %66 = vector.broadcast %cst_35 : f32 to vector<8x1xf32>
    %67 = arith.mulf %66, %65 : vector<8x1xf32>
    %68 = arith.mulf %67, %58 : vector<8x1xf32>
    %cst_36 = arith.constant 1.000000e+00 : f32
    %69 = vector.broadcast %cst_36 : f32 to vector<8x1xf32>
    %70 = arith.addf %69, %58 : vector<8x1xf32>
    %71 = tpu.reciprocal %70 {approx = true} : vector<8x1xf32> -> vector<8x1xf32>
    %72 = arith.mulf %68, %71 : vector<8x1xf32>
    %cst_37 = arith.constant 7.000000e+00 : f32
    %73 = math.log %cst_37 : f32
    %cst_38 = arith.constant 7.000000e+00 : f32
    %74 = arith.mulf %cst_38, %73 : f32
    %75 = vector.broadcast %74 : f32 to vector<8x1xf32>
    %76 = arith.subf %72, %75 : vector<8x1xf32>
    %c0_39 = arith.constant 0 : index
    %c0_40 = arith.constant 0 : index
    %77 = vector.load %arg16[%c0_39, %c0_40] : memref<8x16xf32, #tpu.memory_space<vmem>>, vector<8x16xf32>
    %c0_41 = arith.constant 0 : index
    %c0_42 = arith.constant 0 : index
    %78 = vector.load %arg17[%c0_41, %c0_42] : memref<8x16xf32, #tpu.memory_space<vmem>>, vector<8x16xf32>
    %cst_43 = arith.constant 1.000000e+00 : f32
    %79 = vector.broadcast %cst_43 : f32 to vector<8x1xf32>
    %80 = arith.subf %79, %58 : vector<8x1xf32>
    %81 = vector.broadcast %80 : vector<8x1xf32> to vector<8x16xf32>
    %82 = arith.mulf %81, %77 : vector<8x16xf32>
    %cst_44 = arith.constant 1.000000e+00 : f32
    %83 = vector.broadcast %cst_44 : f32 to vector<8x16xf32>
    %84 = arith.subf %83, %82 : vector<8x16xf32>
    %85 = tpu.reciprocal %84 {approx = true} : vector<8x16xf32> -> vector<8x16xf32>
    %cst_45 = arith.constant 1.000000e+00 : f32
    %86 = vector.broadcast %cst_45 : f32 to vector<8x1xf32>
    %87 = arith.addf %86, %58 : vector<8x1xf32>
    %88 = vector.broadcast %87 : vector<8x1xf32> to vector<8x16xf32>
    %89 = arith.mulf %88, %77 : vector<8x16xf32>
    %cst_46 = arith.constant 1.000000e+00 : f32
    %90 = vector.broadcast %cst_46 : f32 to vector<8x16xf32>
    %91 = arith.subf %90, %89 : vector<8x16xf32>
    %92 = arith.mulf %91, %85 : vector<8x16xf32>
    %cst_47 = arith.constant 2.000000e+00 : f32
    %93 = vector.broadcast %cst_47 : f32 to vector<8x1xf32>
    %94 = arith.mulf %93, %65 : vector<8x1xf32>
    %95 = arith.mulf %94, %58 : vector<8x1xf32>
    %96 = vector.broadcast %95 : vector<8x1xf32> to vector<8x16xf32>
    %97 = arith.mulf %96, %85 : vector<8x16xf32>
    %98 = math.log %97 : vector<8x16xf32>
    %cst_48 = arith.constant 7.000000e+00 : f32
    %99 = vector.broadcast %cst_48 : f32 to vector<8x16xf32>
    %100 = arith.mulf %99, %98 : vector<8x16xf32>
    %101 = arith.subf %100, %97 : vector<8x16xf32>
    %102 = vector.broadcast %76 : vector<8x1xf32> to vector<8x16xf32>
    %103 = arith.addf %101, %102 : vector<8x16xf32>
    %104 = math.log %78 : vector<8x16xf32>
    %105 = arith.cmpf oge, %103, %104 : vector<8x16xf32>
    %c0_49 = arith.constant 0 : index
    %c0_50 = arith.constant 0 : index
    %106 = vector.load %arg15[%c0_49, %c0_50] : memref<1x16xf32, #tpu.memory_space<vmem>>, vector<1x16xf32>
    %cst_51 = arith.constant 1.600000e+01 : f32
    %107 = vector.shape_cast %106 : vector<1x16xf32> to vector<1x16xf32>
    %108 = vector.broadcast %107 : vector<1x16xf32> to vector<8x16xf32>
    %109 = vector.broadcast %cst_51 : f32 to vector<8x16xf32>
    %110 = arith.select %105, %108, %109 : vector<8x16xi1>, vector<8x16xf32>
    %cst_52 = arith.constant dense<0x7F800000> : vector<8xf32>
    %111 = vector.multi_reduction <minimumf>, %110, %cst_52 [1] : vector<8x16xf32> to vector<8xf32>
    %112 = vector.shape_cast %111 : vector<8xf32> to vector<8x1xf32>
    %113 = vector.broadcast %112 : vector<8x1xf32> to vector<8x16xf32>
    %114 = arith.cmpf oeq, %110, %113 : vector<8x16xf32>
    %115 = arith.extui %114 : vector<8x16xi1> to vector<8x16xi32>
    %116 = arith.sitofp %115 : vector<8x16xi32> to vector<8x16xf32>
    %117 = arith.extui %105 : vector<8x16xi1> to vector<8x16xi32>
    %118 = arith.sitofp %117 : vector<8x16xi32> to vector<8x16xf32>
    %119 = arith.mulf %116, %118 : vector<8x16xf32>
    %cst_53 = arith.constant 1.600000e+01 : f32
    %120 = vector.broadcast %cst_53 : f32 to vector<8x1xf32>
    %121 = arith.cmpf olt, %112, %120 : vector<8x1xf32>
    %122 = arith.extui %121 : vector<8x1xi1> to vector<8x1xi32>
    %123 = arith.sitofp %122 : vector<8x1xi32> to vector<8x1xf32>
    %124 = arith.mulf %92, %119 : vector<8x16xf32>
    %cst_54 = arith.constant dense<0.000000e+00> : vector<8xf32>
    %125 = vector.multi_reduction <add>, %124, %cst_54 [1] : vector<8x16xf32> to vector<8xf32>
    %126 = vector.shape_cast %125 : vector<8xf32> to vector<8x1xf32>
    %127 = arith.mulf %126, %123 : vector<8x1xf32>
    %128 = vector.extract_strided_slice %92 {offsets = [0, 0], sizes = [8, 1], strides = [1, 1]} : vector<8x16xf32> to vector<8x1xf32>
    %cst_55 = arith.constant 1.000000e+00 : f32
    %129 = vector.broadcast %cst_55 : f32 to vector<8x1xf32>
    %130 = arith.subf %129, %123 : vector<8x1xf32>
    %131 = arith.mulf %128, %130 : vector<8x1xf32>
    %132 = arith.addf %127, %131 : vector<8x1xf32>
    %cst_56 = arith.constant -1.000000e+00 : f32
    %cst_57 = arith.constant 1.000000e+00 : f32
    %133 = vector.broadcast %cst_56 : f32 to vector<8x1xf32>
    %134 = arith.maximumf %133, %132 : vector<8x1xf32>
    %135 = vector.broadcast %cst_57 : f32 to vector<8x1xf32>
    %136 = arith.minimumf %135, %134 : vector<8x1xf32>
    %c0_58 = arith.constant 0 : index
    %c0_59 = arith.constant 0 : index
    %137 = vector.load %arg14[%c0_58, %c0_59] : memref<1x128xf32, #tpu.memory_space<vmem>>, vector<1x128xf32>
    %c0_60 = arith.constant 0 : index
    %c0_61 = arith.constant 0 : index
    %138 = vector.load %arg18[%c0_60, %c0_61] : memref<8x128xf32, #tpu.memory_space<vmem>>, vector<8x128xf32>
    %139 = arith.mulf %138, %138 : vector<8x128xf32>
    %cst_62 = arith.constant dense<0.000000e+00> : vector<8xf32>
    %140 = vector.multi_reduction <add>, %139, %cst_62 [1] : vector<8x128xf32> to vector<8xf32>
    %141 = vector.shape_cast %140 : vector<8xf32> to vector<8x1xf32>
    %cst_63 = arith.constant 9.99999996E-13 : f32
    %142 = vector.broadcast %cst_63 : f32 to vector<8x1xf32>
    %143 = arith.addf %141, %142 : vector<8x1xf32>
    %144 = math.rsqrt %143 : vector<8x1xf32>
    %145 = vector.broadcast %144 : vector<8x1xf32> to vector<8x128xf32>
    %146 = arith.mulf %138, %145 : vector<8x128xf32>
    %cst_64 = arith.constant 1.000000e+00 : f32
    %147 = vector.broadcast %cst_64 : f32 to vector<8x1xf32>
    %148 = arith.subf %147, %136 : vector<8x1xf32>
    %cst_65 = arith.constant 1.000000e+00 : f32
    %149 = vector.broadcast %cst_65 : f32 to vector<8x1xf32>
    %150 = arith.addf %149, %136 : vector<8x1xf32>
    %151 = arith.mulf %148, %150 : vector<8x1xf32>
    %cst_66 = arith.constant 0.000000e+00 : f32
    %152 = vector.broadcast %cst_66 : f32 to vector<8x1xf32>
    %153 = arith.maximumf %151, %152 : vector<8x1xf32>
    %154 = math.sqrt %153 : vector<8x1xf32>
    %155 = vector.broadcast %136 : vector<8x1xf32> to vector<8x128xf32>
    %156 = vector.broadcast %137 : vector<1x128xf32> to vector<8x128xf32>
    %157 = arith.mulf %155, %156 : vector<8x128xf32>
    %158 = vector.broadcast %154 : vector<8x1xf32> to vector<8x128xf32>
    %159 = arith.mulf %158, %146 : vector<8x128xf32>
    %160 = arith.addf %157, %159 : vector<8x128xf32>
    %161 = vector.broadcast %137 : vector<1x128xf32> to vector<8x128xf32>
    %162 = arith.subf %161, %28 : vector<8x128xf32>
    %163 = arith.mulf %162, %162 : vector<8x128xf32>
    %cst_67 = arith.constant dense<0.000000e+00> : vector<8xf32>
    %164 = vector.multi_reduction <add>, %163, %cst_67 [1] : vector<8x128xf32> to vector<8xf32>
    %165 = vector.shape_cast %164 : vector<8xf32> to vector<8x1xf32>
    %cst_68 = arith.constant 9.99999996E-13 : f32
    %166 = vector.broadcast %cst_68 : f32 to vector<8x1xf32>
    %167 = arith.addf %165, %166 : vector<8x1xf32>
    %168 = math.rsqrt %167 : vector<8x1xf32>
    %169 = vector.broadcast %168 : vector<8x1xf32> to vector<8x128xf32>
    %170 = arith.mulf %162, %169 : vector<8x128xf32>
    %171 = arith.mulf %170, %160 : vector<8x128xf32>
    %cst_69 = arith.constant dense<0.000000e+00> : vector<8xf32>
    %172 = vector.multi_reduction <add>, %171, %cst_69 [1] : vector<8x128xf32> to vector<8xf32>
    %173 = vector.shape_cast %172 : vector<8xf32> to vector<8x1xf32>
    %cst_70 = arith.constant 2.000000e+00 : f32
    %174 = vector.broadcast %cst_70 : f32 to vector<8x1xf32>
    %175 = arith.mulf %174, %173 : vector<8x1xf32>
    %176 = vector.broadcast %175 : vector<8x1xf32> to vector<8x128xf32>
    %177 = arith.mulf %176, %170 : vector<8x128xf32>
    %178 = arith.subf %160, %177 : vector<8x128xf32>
    %c0_71 = arith.constant 0 : index
    %c0_72 = arith.constant 0 : index
    %179 = vector.load %arg10[%c0_71, %c0_72] : memref<128x32xf32, #tpu.memory_space<vmem>>, vector<128x32xf32>
    %cst_73 = arith.constant dense<0.000000e+00> : vector<8x32xf32>
    %180 = tpu.matmul %178, %179, %cst_73 {dimension_numbers = #tpu.dot_dimension_numbers<[1], [0], [0], [1], [0, 0, 1, 1], [], []>} : vector<8x128xf32>, vector<128x32xf32>, vector<8x32xf32> -> vector<8x32xf32>
    %c0_74 = arith.constant 0 : index
    %c0_75 = arith.constant 0 : index
    %181 = vector.load %arg11[%c0_74, %c0_75] : memref<1x32xf32, #tpu.memory_space<vmem>>, vector<1x32xf32>
    %182 = vector.broadcast %181 : vector<1x32xf32> to vector<8x32xf32>
    %183 = arith.addf %180, %182 : vector<8x32xf32>
    %cst_76 = arith.constant 0.000000e+00 : f32
    %184 = vector.broadcast %cst_76 : f32 to vector<8x32xf32>
    %185 = arith.maximumf %183, %184 : vector<8x32xf32>
    %186 = arith.truncf %185 : vector<8x32xf32> to vector<8x32xbf16>
    %c0_77 = arith.constant 0 : index
    %c0_78 = arith.constant 0 : index
    %187 = vector.load %arg12[%c0_77, %c0_78] : memref<32x1024xbf16, #tpu.memory_space<vmem>>, vector<32x1024xbf16>
    %cst_79 = arith.constant dense<0.000000e+00> : vector<8x1024xf32>
    %188 = tpu.matmul %186, %187, %cst_79 {dimension_numbers = #tpu.dot_dimension_numbers<[1], [0], [0], [1], [0, 0, 1, 1], [], []>} : vector<8x32xbf16>, vector<32x1024xbf16>, vector<8x1024xf32> -> vector<8x1024xf32>
    %c0_80 = arith.constant 0 : index
    %c0_81 = arith.constant 0 : index
    %189 = vector.load %arg13[%c0_80, %c0_81] : memref<1x1024xf32, #tpu.memory_space<vmem>>, vector<1x1024xf32>
    %190 = vector.broadcast %189 : vector<1x1024xf32> to vector<8x1024xf32>
    %191 = arith.addf %188, %190 : vector<8x1024xf32>
    %c0_82 = arith.constant 0 : index
    %c0_83 = arith.constant 0 : index
    %192 = vector.load %arg19[%c0_82, %c0_83] : memref<8x1024xf32, #tpu.memory_space<vmem>>, vector<8x1024xf32>
    tpu.vector_store %arg19[%c0_82, %c0_83], %191 {strides = array<i32>} : memref<8x1024xf32, #tpu.memory_space<vmem>>, vector<8x1024xf32>,
    %c0_84 = arith.constant 0 : index
    %c0_85 = arith.constant 0 : index
    %193 = vector.load %arg20[%c0_84, %c0_85] : memref<8x128xf32, #tpu.memory_space<vmem>>, vector<8x128xf32>
    tpu.vector_store %arg20[%c0_84, %c0_85], %178 {strides = array<i32>} : memref<8x128xf32, #tpu.memory_space<vmem>>, vector<8x128xf32>,
    return
  }
  func.func @transform_0(%arg0: i32) -> (i32, i32) {
    %c0_i32 = arith.constant 0 : i32
    %c0_i32_0 = arith.constant 0 : i32
    return %arg0, %c0_i32 : i32, i32
  }
  func.func @transform_1(%arg0: i32) -> (i32, i32) {
    %c0_i32 = arith.constant 0 : i32
    %c0_i32_0 = arith.constant 0 : i32
    %c0_i32_1 = arith.constant 0 : i32
    return %c0_i32, %c0_i32_0 : i32, i32
  }
  func.func @transform_2(%arg0: i32) -> (i32, i32) {
    %c0_i32 = arith.constant 0 : i32
    %c0_i32_0 = arith.constant 0 : i32
    %c0_i32_1 = arith.constant 0 : i32
    return %c0_i32, %c0_i32_0 : i32, i32
  }
  func.func @transform_3(%arg0: i32) -> (i32, i32) {
    %c0_i32 = arith.constant 0 : i32
    %c0_i32_0 = arith.constant 0 : i32
    %c0_i32_1 = arith.constant 0 : i32
    return %c0_i32, %c0_i32_0 : i32, i32
  }
  func.func @transform_4(%arg0: i32) -> (i32, i32) {
    %c0_i32 = arith.constant 0 : i32
    %c0_i32_0 = arith.constant 0 : i32
    %c0_i32_1 = arith.constant 0 : i32
    return %c0_i32, %c0_i32_0 : i32, i32
  }
  func.func @transform_5(%arg0: i32) -> (i32, i32) {
    %c0_i32 = arith.constant 0 : i32
    %c0_i32_0 = arith.constant 0 : i32
    %c0_i32_1 = arith.constant 0 : i32
    return %c0_i32, %c0_i32_0 : i32, i32
  }
  func.func @transform_6(%arg0: i32) -> (i32, i32) {
    %c0_i32 = arith.constant 0 : i32
    %c0_i32_0 = arith.constant 0 : i32
    %c0_i32_1 = arith.constant 0 : i32
    return %c0_i32, %c0_i32_0 : i32, i32
  }
  func.func @transform_7(%arg0: i32) -> (i32, i32) {
    %c0_i32 = arith.constant 0 : i32
    %c0_i32_0 = arith.constant 0 : i32
    %c0_i32_1 = arith.constant 0 : i32
    return %c0_i32, %c0_i32_0 : i32, i32
  }
  func.func @transform_8(%arg0: i32) -> (i32, i32) {
    %c0_i32 = arith.constant 0 : i32
    %c0_i32_0 = arith.constant 0 : i32
    %c0_i32_1 = arith.constant 0 : i32
    return %c0_i32, %c0_i32_0 : i32, i32
  }
  func.func @transform_9(%arg0: i32) -> (i32, i32) {
    %c0_i32 = arith.constant 0 : i32
    %c0_i32_0 = arith.constant 0 : i32
    %c0_i32_1 = arith.constant 0 : i32
    return %c0_i32, %c0_i32_0 : i32, i32
  }
  func.func @transform_10(%arg0: i32) -> (i32, i32) {
    %c0_i32 = arith.constant 0 : i32
    %c0_i32_0 = arith.constant 0 : i32
    %c0_i32_1 = arith.constant 0 : i32
    return %c0_i32, %c0_i32_0 : i32, i32
  }
  func.func @transform_11(%arg0: i32) -> (i32, i32) {
    %c0_i32 = arith.constant 0 : i32
    %c0_i32_0 = arith.constant 0 : i32
    %c0_i32_1 = arith.constant 0 : i32
    return %c0_i32, %c0_i32_0 : i32, i32
  }
  func.func @transform_12(%arg0: i32) -> (i32, i32) {
    %c0_i32 = arith.constant 0 : i32
    %c0_i32_0 = arith.constant 0 : i32
    %c0_i32_1 = arith.constant 0 : i32
    return %c0_i32, %c0_i32_0 : i32, i32
  }
  func.func @transform_13(%arg0: i32) -> (i32, i32) {
    %c0_i32 = arith.constant 0 : i32
    %c0_i32_0 = arith.constant 0 : i32
    %c0_i32_1 = arith.constant 0 : i32
    return %c0_i32, %c0_i32_0 : i32, i32
  }
  func.func @transform_14(%arg0: i32) -> (i32, i32) {
    %c0_i32 = arith.constant 0 : i32
    %c0_i32_0 = arith.constant 0 : i32
    %c0_i32_1 = arith.constant 0 : i32
    return %c0_i32, %c0_i32_0 : i32, i32
  }
  func.func @transform_15(%arg0: i32) -> (i32, i32) {
    %c0_i32 = arith.constant 0 : i32
    %c0_i32_0 = arith.constant 0 : i32
    return %arg0, %c0_i32 : i32, i32
  }
  func.func @transform_16(%arg0: i32) -> (i32, i32) {
    %c0_i32 = arith.constant 0 : i32
    %c0_i32_0 = arith.constant 0 : i32
    return %arg0, %c0_i32 : i32, i32
  }
  func.func @transform_17(%arg0: i32) -> (i32, i32) {
    %c0_i32 = arith.constant 0 : i32
    %c0_i32_0 = arith.constant 0 : i32
    return %arg0, %c0_i32 : i32, i32
  }
  func.func @transform_18(%arg0: i32) -> (i32, i32) {
    %c0_i32 = arith.constant 0 : i32
    %c0_i32_0 = arith.constant 0 : i32
    return %arg0, %c0_i32 : i32, i32
  }
  func.func @transform_19(%arg0: i32) -> (i32, i32) {
    %c0_i32 = arith.constant 0 : i32
    %c0_i32_0 = arith.constant 0 : i32
    return %arg0, %c0_i32 : i32, i32
  }
}

</mosaic_0001>

<bundles_post_ra>
// kernel: svae_forward.1
= control target key start
LH: loop header
LB: loop body
LE: loop exit
PB: predicated region body
PF: predicated region fallthrough
CT: control target
= control target key end

     0   :  { %vm1895_vm0 = vmmov 0   ;;  %vm771_vm1 = vcmask 261120   ;;  %vm1041_vm5 = vcmask 130048   ;;  %s2460_s1 = inlined_call_operand.vmem [shape: bf16[1024,32], index: 1, kind: input, shape index: {}]   ;;  %s2461_s0 = inlined_call_operand.vmem [shape: f32[8,1024], index: 0, kind: input, shape index: {}]   ;;  %s2462_s3 = inlined_call_operand.vmem [shape: f32[32,32], index: 3, kind: input, shape index: {}]   ;;  %s2463_s5 = inlined_call_operand.vmem [shape: f32[32,128], index: 5, kind: input, shape index: {}]   ;;  %s2464_s2 = inlined_call_operand.vmem [shape: f32[1,32], index: 2, kind: input, shape index: {}]   ;;  %s2465_s8 = inlined_call_operand.<no memory space> [shape: f32[1,1], index: 8, kind: input, shape index: {}]   ;;  %s2466_s4 = inlined_call_operand.vmem [shape: f32[1,32], index: 4, kind: input, shape index: {}]   ;;  %s2467_s7 = inlined_call_operand.vmem [shape: f32[1,32], index: 7, kind: input, shape index: {}]   ;;  %s2468_s6 = inlined_call_operand.vmem [shape: f32[1,128], index: 6, kind: input, shape index: {}]   ;;  %s2469_s17 = inlined_call_operand.vmem [shape: f32[8,128], index: 17, kind: input, shape index: {}]   ;;  %s2470_s15 = inlined_call_operand.vmem [shape: f32[8,16], index: 15, kind: input, shape index: {}]   ;;  %s2471_s16 = inlined_call_operand.vmem [shape: f32[8,16], index: 16, kind: input, shape index: {}]   ;;  %s2472_s14 = inlined_call_operand.vmem [shape: f32[1,16], index: 14, kind: input, shape index: {}]   ;;  %s2473_s13 = inlined_call_operand.vmem [shape: f32[1,128], index: 13, kind: input, shape index: {}]   ;;  %s2474_s9 = inlined_call_operand.vmem [shape: f32[128,32], index: 9, kind: input, shape index: {}]   ;;  %s2475_s11 = inlined_call_operand.vmem [shape: bf16[32,1024], index: 11, kind: input, shape index: {}]   ;;  %s2476_s19 = inlined_call_operand.vmem [shape: f32[8,128], index: 19, kind: output, shape index: {1}]   ;;  %s2477_s10 = inlined_call_operand.vmem [shape: f32[1,32], index: 10, kind: input, shape index: {}]   ;;  %s2478_s12 = inlined_call_operand.vmem [shape: f32[1,1024], index: 12, kind: input, shape index: {}]   ;;  %s2479_s18 = inlined_call_operand.vmem [shape: f32[8,1024], index: 18, kind: output, shape index: {0}]  }
   0x1   :  { %2484 = sst [smem:[#allocation3_spill]] %s2460_s1 }
   0x2   :  { %2485 = sst [smem:[#allocation4_spill]] %s2461_s0 }
   0x3   :  { %2486 = sst [smem:[#allocation5_spill]] %s2462_s3 }
   0x4   :  { %2487 = sst [smem:[#allocation6_spill]] %s2463_s5 }
   0x5   :  { %s2488_s20 = sld [smem:[#allocation3_spill]] }
   0x6   :  { %s2489_s26 = sld [smem:[#allocation4_spill]] }
   0x7   :  { %s2490_s28 = sld [smem:[#allocation5_spill]] }
   0x8   :  { %s2491_s23 = sld [smem:[#allocation6_spill]] }
   0xb   :  { %v1808_v0 = vld [vmem:[%s2488_s20 + $0x78] sm:$0xff]   ;;  %v1812_v4 = vld [vmem:[%s2488_s20 + $0x70] sm:$0xff]   ;;  %v1816_v8 = vld [vmem:[%s2488_s20 + $0x68] sm:$0xff]  }
   0xc   :  { %v1809_v1 = vld [vmem:[%s2488_s20 + $0xf8] sm:$0xff]   ;;  %1631 = vmatprep.subr.bf16.mxu0 %v1808_v0  ;;  %v1813_v5 = vld [vmem:[%s2488_s20 + $0xf0] sm:$0xff]   ;;  %v1817_v9 = vld [vmem:[%s2488_s20 + $0xe8] sm:$0xff]  }
   0xd   :  { %v1810_v2 = vld [vmem:[%s2488_s20 + $0x38] sm:$0xff]   ;;  %1653 = vmatprep.subr.bf16.mxu1 %v1809_v1  ;;  %v1814_v6 = vld [vmem:[%s2488_s20 + $0x30] sm:$0xff]   ;;  %v1818_v10 = vld [vmem:[%s2488_s20 + $0x28] sm:$0xff]  }
   0xe   :  { %v1811_v3 = vld [vmem:[%s2488_s20 + $0xb8] sm:$0xff]   ;;  %1632 = vmatpush3.bf16.msra.mxu0 %v1810_v2  ;;  %v1815_v7 = vld [vmem:[%s2488_s20 + $0xb0] sm:$0xff]   ;;  %v1819_v11 = vld [vmem:[%s2488_s20 + $0xa8] sm:$0xff]  }
   0xf   :  { %1654 = vmatpush3.bf16.msra.mxu1 %v1811_v3  ;;  %1633 = vmatprep.subr.bf16.mxu0 %v1812_v4  ;;  %v1820_v12 = vld [vmem:[%s2488_s20 + $0x60] sm:$0xff]   ;;  %v1824_v16 = vld [vmem:[%s2488_s20 + $0x58] sm:$0xff]   ;;  %v1828_v20 = vld [vmem:[%s2488_s20 + $0x50] sm:$0xff]  }
  0x10   :  { %1655 = vmatprep.subr.bf16.mxu1 %v1813_v5  ;;  %v1821_v13 = vld [vmem:[%s2488_s20 + $0xe0] sm:$0xff]   ;;  %v1825_v17 = vld [vmem:[%s2488_s20 + $0xd8] sm:$0xff]   ;;  %v1829_v21 = vld [vmem:[%s2488_s20 + $0xd0] sm:$0xff]  }
  0x11   :  { %v1822_v14 = vld [vmem:[%s2488_s20 + $0x20] sm:$0xff]   ;;  %v1826_v18 = vld [vmem:[%s2488_s20 + $0x18] sm:$0xff]   ;;  %v1830_v22 = vld [vmem:[%s2488_s20 + $0x10] sm:$0xff]  }
  0x12   :  { %1634 = vmatpush3.bf16.msra.mxu0 %v1814_v6  ;;  %v1823_v15 = vld [vmem:[%s2488_s20 + $0xa0] sm:$0xff]   ;;  %v1827_v19 = vld [vmem:[%s2488_s20 + $0x98] sm:$0xff]   ;;  %v1831_v23 = vld [vmem:[%s2488_s20 + $0x90] sm:$0xff]  }
  0x13   :  { %1656 = vmatpush3.bf16.msra.mxu1 %v1815_v7  ;;  %1635 = vmatprep.subr.bf16.mxu0 %v1816_v8  ;;  %v1832_v24 = vld [vmem:[%s2488_s20 + $0x48] sm:$0xff]   ;;  %v1836_v28 = vld [vmem:[%s2488_s20 + $0x40] sm:$0xff]   ;;  %v67_v33 = vld [vmem:[%s2489_s26 + $0x18] sm:$0xff] }
  0x14   :  { %1657 = vmatprep.subr.bf16.mxu1 %v1817_v9  ;;  %v1833_v25 = vld [vmem:[%s2488_s20 + $0xc8] sm:$0xff]   ;;  %v1837_v29 = vld [vmem:[%s2488_s20 + $0xc0] sm:$0xff]   ;;  %v75_v36 = vpack.c.bf16 %v67_v33, %v67_v33  ;;  %v66_v38 = vld [vmem:[%s2489_s26 + $0x10] sm:$0xff] }
  0x15   :  { %v1834_v26 = vld [vmem:[%s2488_s20 + $0x8] sm:$0xff]   ;;  %v1838_v30 = vld [vmem:[%s2488_s20] sm:$0xff]   ;;  %v74_v39 = vpack.c.bf16 %v66_v38, %v66_v38  ;;  %v1840_v40 = vld [vmem:[%s2488_s20 + $0x178] sm:$0xff]  }
  0x16   :  { %1636 = vmatpush3.bf16.msra.mxu0 %v1818_v10  ;;  %v1835_v27 = vld [vmem:[%s2488_s20 + $0x88] sm:$0xff]   ;;  %v1839_v31 = vld [vmem:[%s2488_s20 + $0x80] sm:$0xff]   ;;  %671 = vmatprep.mubr.bf16.mxu1 %v75_v36  ;;  %v1841_v41 = vld [vmem:[%s2488_s20 + $0x1f8] sm:$0xff]  }
  0x17   :  { %1658 = vmatpush3.bf16.msra.mxu1 %v1819_v11  ;;  %1637 = vmatprep.subr.bf16.mxu0 %v1820_v12  ;;  %v65_v32 = vld [vmem:[%s2489_s26 + $0x8] sm:$0xff]  ;;  %v64_v34 = vld [vmem:[%s2489_s26] sm:$0xff]  ;;  %v1842_v42 = vld [vmem:[%s2488_s20 + $0x138] sm:$0xff]  }
  0x18   :  { %1659 = vmatprep.subr.bf16.mxu1 %v1821_v13  ;;  %v73_v35 = vpack.c.bf16 %v65_v32, %v65_v32  ;;  %v72_v37 = vpack.c.bf16 %v64_v34, %v64_v34  ;;  %v1843_v43 = vld [vmem:[%s2488_s20 + $0x1b8] sm:$0xff]   ;;  %v1844_v44 = vld [vmem:[%s2488_s20 + $0x170] sm:$0xff]   ;;  %v1848_v48 = vld [vmem:[%s2488_s20 + $0x168] sm:$0xff]  }
  0x19   :  { %v1845_v45 = vld [vmem:[%s2488_s20 + $0x1f0] sm:$0xff]   ;;  %v1849_v49 = vld [vmem:[%s2488_s20 + $0x1e8] sm:$0xff]   ;;  %v1852_v52 = vld [vmem:[%s2488_s20 + $0x160] sm:$0xff]  }
  0x1a   :  { %1638 = vmatpush3.bf16.msra.mxu0 %v1822_v14  ;;  %631 = vmatprep.mubr.bf16.mxu0 %v73_v35  ;;  %v1846_v46 = vld [vmem:[%s2488_s20 + $0x130] sm:$0xff]   ;;  %v1850_v50 = vld [vmem:[%s2488_s20 + $0x128] sm:$0xff]   ;;  %v1853_v53 = vld [vmem:[%s2488_s20 + $0x1e0] sm:$0xff]  }
  0x1b   :  { %1660 = vmatpush3.bf16.msra.mxu1 %v1823_v15  ;;  %1639 = vmatprep.subr.bf16.mxu0 %v1824_v16  ;;  %v1847_v47 = vld [vmem:[%s2488_s20 + $0x1b0] sm:$0xff]   ;;  %v1851_v51 = vld [vmem:[%s2488_s20 + $0x1a8] sm:$0xff]   ;;  %v1854_v54 = vld [vmem:[%s2488_s20 + $0x120] sm:$0xff]   ;;  %v1894_v16 = vmov 0.0  }
  0x1c   :  { %1661 = vmatprep.subr.bf16.mxu1 %v1825_v17  ;;  %v1855_v55 = vld [vmem:[%s2488_s20 + $0x1a0] sm:$0xff]   ;;  %v1856_v56 = vld [vmem:[%s2488_s20 + $0x158] sm:$0xff]   ;;  %v1860_v60 = vld [vmem:[%s2488_s20 + $0x150] sm:$0xff]  }
  0x1d   :  { %v1857_v57 = vld [vmem:[%s2488_s20 + $0x1d8] sm:$0xff]   ;;  %v1861_v61 = vld [vmem:[%s2488_s20 + $0x1d0] sm:$0xff]   ;;  %v1864_v0 = vld [vmem:[%s2488_s20 + $0x148] sm:$0xff]  }
  0x1e   :  { %1640 = vmatpush3.bf16.msra.mxu0 %v1826_v18  ;;  %v1858_v58 = vld [vmem:[%s2488_s20 + $0x118] sm:$0xff]   ;;  %v1862_v62 = vld [vmem:[%s2488_s20 + $0x110] sm:$0xff]   ;;  %v1865_v1 = vld [vmem:[%s2488_s20 + $0x1c8] sm:$0xff]  }
  0x1f   :  { %1662 = vmatpush3.bf16.msra.mxu1 %v1827_v19  ;;  %1641 = vmatprep.subr.bf16.mxu0 %v1828_v20  ;;  %v1859_v59 = vld [vmem:[%s2488_s20 + $0x198] sm:$0xff]   ;;  %v1863_v63 = vld [vmem:[%s2488_s20 + $0x190] sm:$0xff]   ;;  %v1866_v2 = vld [vmem:[%s2488_s20 + $0x108] sm:$0xff]  }
  0x20   :  { %1663 = vmatprep.subr.bf16.mxu1 %v1829_v21  ;;  %v1867_v3 = vld [vmem:[%s2488_s20 + $0x188] sm:$0xff]   ;;  %v1868_v4 = vld [vmem:[%s2488_s20 + $0x140] sm:$0xff]   ;;  %v71_v9 = vld [vmem:[%s2489_s26 + $0x38] sm:$0xff] }
  0x21   :  { %v1869_v5 = vld [vmem:[%s2488_s20 + $0x1c0] sm:$0xff]   ;;  %v69_v8 = vld [vmem:[%s2489_s26 + $0x28] sm:$0xff]  ;;  %v79_v11 = vpack.c.bf16 %v71_v9, %v71_v9  ;;  %v70_v13 = vld [vmem:[%s2489_s26 + $0x30] sm:$0xff] }
  0x22   :  { %1642 = vmatpush3.bf16.msra.mxu0 %v1830_v22  ;;  %v1870_v6 = vld [vmem:[%s2488_s20 + $0x100] sm:$0xff]   ;;  %v77_v10 = vpack.c.bf16 %v69_v8, %v69_v8  ;;  %v78_v15 = vpack.c.bf16 %v70_v13, %v70_v13  ;;  %v763_v17 = vld [vmem:[%s2490_s28 + $0x18] sm:$0xff]  ;;  %v762_v18 = vld [vmem:[%s2490_s28 + $0x10] sm:$0xff] }
  0x23   :  { %1664 = vmatpush3.bf16.msra.mxu1 %v1831_v23  ;;  %1643 = vmatprep.subr.bf16.mxu0 %v1832_v24  ;;  %v1871_v7 = vld [vmem:[%s2488_s20 + $0x180] sm:$0xff]   ;;  %v761_v19 = vld [vmem:[%s2490_s28 + $0x8] sm:$0xff]  ;;  %v849_v21 = vld [vmem:[%s2491_s23 + $0x18] sm:$0xff] }
  0x24   :  { %1665 = vmatprep.subr.bf16.mxu1 %v1833_v25  ;;  %v68_v12 = vld [vmem:[%s2489_s26 + $0x20] sm:$0xff] }
  0x25   :  { %v76_v14 = vpack.c.bf16 %v68_v12, %v68_v12  ;;  %v760_v20 = vld [vmem:[%s2490_s28] sm:$0xff] }
  0x26   :  { %1644 = vmatpush3.bf16.msra.mxu0 %v1834_v26 }
  0x27   :  { %1666 = vmatpush3.bf16.msra.mxu1 %v1835_v27  ;;  %1645 = vmatprep.subr.bf16.mxu0 %v1836_v28 }
  0x28   :  { %1667 = vmatprep.subr.bf16.mxu1 %v1837_v29 }
  0x2a   :  { %1646 = vmatpush3.bf16.msra.mxu0 %v1838_v30 }
  0x2b   :  { %1668 = vmatpush3.bf16.msra.mxu1 %v1839_v31  ;;  %1675 = vmatprep.subr.bf16.mxu0 %v1840_v40  ;;  %v1532_v31 = vld [vmem:[%s2464_s2] ss:$0 sm:$0xff] }
  0x2c   :  { %1697 = vmatprep.subr.bf16.mxu1 %v1841_v41 }
  0x2d   :  { %632 = vmatmul.mubr.bf16.vlgmr.msra.gmra.mxu0 %v72_v37 }
  0x2e   :  { %672 = vmatmul.mubr.bf16.vlgmr.msra.gmra.mxu1 %v74_v39  ;;  %1676 = vmatpush3.bf16.msra.mxu0 %v1842_v42 }
  0x2f   :  { %1698 = vmatpush3.bf16.msra.mxu1 %v1843_v43  ;;  %1677 = vmatprep.subr.bf16.mxu0 %v1844_v44 }
  0x30   :  { %1699 = vmatprep.subr.bf16.mxu1 %v1845_v45  ;;  %711 = vmatprep.mubr.bf16.mxu0 %v77_v10 }
  0x31   :  { %751 = vmatprep.mubr.bf16.mxu1 %v79_v11 }
  0x32   :  { %1678 = vmatpush3.bf16.msra.mxu0 %v1846_v46 }
  0x33   :  { %1700 = vmatpush3.bf16.msra.mxu1 %v1847_v47  ;;  %1679 = vmatprep.subr.bf16.mxu0 %v1848_v48  ;;  %v848_v48 = vld [vmem:[%s2491_s23 + $0x10] sm:$0xff] }
  0x34   :  { %1701 = vmatprep.subr.bf16.mxu1 %v1849_v49  ;;  %v847_v49 = vld [vmem:[%s2491_s23 + $0x8] sm:$0xff] }
  0x36   :  { %1680 = vmatpush3.bf16.msra.mxu0 %v1850_v50  ;;  %v846_v50 = vld [vmem:[%s2491_s23] sm:$0xff] }
  0x37   :  { %1702 = vmatpush3.bf16.msra.mxu1 %v1851_v51  ;;  %1681 = vmatprep.subr.bf16.mxu0 %v1852_v52  ;;  %v25_v51 = vstv %s2465_s8  ;;  %v1597_v52 = vld [vmem:[%s2466_s4] ss:$0 sm:$0xff] }
  0x38   :  { %1703 = vmatprep.subr.bf16.mxu1 %v1853_v53  ;;  %26 = vst [vmem:[#allocation2] sm:$0x1] %v25_v51 }
  0x3a   :  { %1682 = vmatpush3.bf16.msra.mxu0 %v1854_v54 }
  0x3b   :  { %1704 = vmatpush3.bf16.msra.mxu1 %v1855_v55  ;;  %1683 = vmatprep.subr.bf16.mxu0 %v1856_v56  ;;  %v1601_v56 = vld [vmem:[%s2467_s7] ss:$0 sm:$0xff] }
  0x3c   :  { %1705 = vmatprep.subr.bf16.mxu1 %v1857_v57 }
  0x3e   :  { %1684 = vmatpush3.bf16.msra.mxu0 %v1858_v58 }
  0x3f   :  { %1706 = vmatpush3.bf16.msra.mxu1 %v1859_v59  ;;  %1685 = vmatprep.subr.bf16.mxu0 %v1860_v60  ;;  %v1896_v60 = vmov 0  }
  0x40   :  { %1707 = vmatprep.subr.bf16.mxu1 %v1861_v61  ;;  %1806 = vset.pattern.permute.xlu0 %v1896_v60  ;;  %v1602_v61 = vld [vmem:[#allocation2] ss:$0 sm:$0xff] }
  0x41   :  { %1807 = vset.pattern.permute.xlu1 %v1896_v60 }
  0x42   :  { %1686 = vmatpush3.bf16.msra.mxu0 %v1862_v62 }
  0x43   :  { %1708 = vmatpush3.bf16.msra.mxu1 %v1863_v63  ;;  %1687 = vmatprep.subr.bf16.mxu0 %v1864_v0 }
  0x44   :  { %1709 = vmatprep.subr.bf16.mxu1 %v1865_v1 }
  0x46   :  { %1688 = vmatpush3.bf16.msra.mxu0 %v1866_v2 }
  0x47   :  { %1710 = vmatpush3.bf16.msra.mxu1 %v1867_v3  ;;  %1689 = vmatprep.subr.bf16.mxu0 %v1868_v4 }
  0x48   :  { %1711 = vmatprep.subr.bf16.mxu1 %v1869_v5 }
  0x4a   :  { %1690 = vmatpush3.bf16.msra.mxu0 %v1870_v6 }
  0x4b   :  { %1712 = vmatpush3.bf16.msra.mxu1 %v1871_v7  ;;  %1746 = vmatprep.subr.mxu0 %v1894_v16 }
  0x4c   :  { %1757 = vmatprep.subr.mxu1 %v1894_v16 }
  0x4d   :  { %712 = vmatmul.mubr.bf16.vlgmr.msra.gmra.mxu0 %v76_v14 }
  0x4e   :  { %752 = vmatmul.mubr.bf16.vlgmr.msra.gmra.mxu1 %v78_v15  ;;  %1747 = vmatpush3.msra.mxu0 %v763_v17 }
  0x4f   :  { %1748 = vmatprep.subr.mxu0 %v1894_v16  ;;  %1754 = vmatprep.mubr.msk.f32.mxu0 %vm1895_vm0, %v1894_v16 }
  0x50   :  { %1749 = vmatpush3.msra.mxu0 %v762_v18  ;;  %1765 = vmatprep.mubr.msk.f32.mxu1 %vm1895_vm0, %v1894_v16 }
  0x51   :  { %1750 = vmatprep.subr.mxu0 %v1894_v16  ;;  %1758 = vmatpush3.msra.mxu1 %v849_v21 }
  0x52   :  { %1751 = vmatpush3.msra.mxu0 %v761_v19  ;;  %1759 = vmatprep.subr.mxu1 %v1894_v16 }
  0x53   :  { %1752 = vmatprep.subr.mxu0 %v1894_v16  ;;  %1760 = vmatpush3.msra.mxu1 %v848_v48 }
  0x54   :  { %1753 = vmatpush3.msra.mxu0 %v760_v20  ;;  %1761 = vmatprep.subr.mxu1 %v1894_v16 }
  0x55   :  { %1768 = vmatprep.subr.mxu0 %v1894_v16  ;;  %1762 = vmatpush3.msra.mxu1 %v847_v49 }
  0x56   :  { %1763 = vmatprep.subr.mxu1 %v1894_v16 }
  0x57   :  { %1764 = vmatpush3.msra.mxu1 %v846_v50 }
  0xed   :  { %v1647_v22 = vpop.f32.mrf.mxu0 }
  0xee   :  { %v1669_v23 = vpop.f32.mrf.mxu1 }
  0xef   :  { %v1648_v24 = vpop.f32.mrf.mxu0 }
  0xf0   :  { %v1670_v25 = vpop.f32.mrf.mxu1  ;;  %v1649_v30 = vadd.f32 %v1648_v24, %v1647_v22 }
  0xf1   :  { %v1650_v26 = vpop.f32.mrf.mxu0  ;;  %v1671_v33 = vadd.f32 %v1670_v25, %v1669_v23 }
  0xf2   :  { %v1672_v27 = vpop.f32.mrf.mxu1  ;;  %v634_v32 = vadd.f32 %v1649_v30, %v1532_v31 }
  0xf3   :  { %v1651_v28 = vpop.f32.mrf.mxu0 }
  0xf4   :  { %v1673_v29 = vpop.f32.mrf.mxu1  ;;  %v674_v37 = vadd.f32 %v1671_v33, %v634_v32 }
 0x10d   :  { %v1691_v34 = vpop.f32.mrf.mxu0 }
 0x10e   :  { %v1713_v35 = vpop.f32.mrf.mxu1 }
 0x10f   :  { %v1692_v36 = vpop.f32.mrf.mxu0 }
 0x110   :  { %v1693_v38 = vadd.f32 %v1692_v36, %v1691_v34  ;;  %v1714_v39 = vpop.f32.mrf.mxu1 }
 0x111   :  { %v1694_v40 = vpop.f32.mrf.mxu0  ;;  %v1715_v42 = vadd.f32 %v1714_v39, %v1713_v35 }
 0x112   :  { %v714_v41 = vadd.f32 %v1693_v38, %v674_v37  ;;  %v1716_v43 = vpop.f32.mrf.mxu1 }
 0x113   :  { %v1695_v44 = vpop.f32.mrf.mxu0 }
 0x114   :  { %v754_v45 = vadd.f32 %v1715_v42, %v714_v41  ;;  %v1717_v46 = vpop.f32.mrf.mxu1  ;;  %v1599_v41 = vld [vmem:[%s2468_s6] ss:$0 sm:$0xff] }
 0x115   :  { %v2276_v44 = vld [vmem:[%s2469_s17] sm:$0xff] }
 0x116   :  { %v759_v47 = vmax.f32 %v754_v45, 0.0  ;;  %v1066_v45 = vmul.f32 %v2276_v44, %v2276_v44  ;;  %v993_v46 = vld [vmem:[%s2470_s15] sm:$0xff] }
 0x118   :  { %1755 = vmatmul.mubr.msk.f32.vlgmr.msra.gmra.mxu0 %vm771_vm1, %v759_v47 }
 0x119   :  { %1800 = vmatprep.mubr.msk.f32.mxu0 %vm1895_vm0, %v1894_v16 }
 0x1d8   :  { %v841_v53 = vpop.f32.mrf.mxu0 }
 0x1d9   :  { %v842_v54 = vadd.f32 %v1597_v52, %v841_v53  ;;  %v994_v53 = vld [vmem:[%s2471_s16] sm:$0xff] }
 0x1da   :  { %v1756_v55 = vpop.f32.mrf.mxu0 }
 0x1db   :  { %v845_v57 = vmax.f32 %v842_v54, 0.0 }
 0x1dd   :  { %1766 = vmatmul.mubr.msk.f32.vlgmr.msra.gmra.mxu1 %vm771_vm1, %v845_v57  ;;  %v943_v58 = vmul.f32 %v1601_v56, %v845_v57 }
 0x1de   :  { %1383 = vmatprep.mubr.bf16.mxu1 %v1896_v60 }
 0x1df   :  { %v944_v59 = vsel %vm771_vm1, %v943_v58, 0.0 }
 0x1e0   :  { %945 = vadd.xlane.f32.xlu0 %v944_v59 }
 0x269   :  { %v946_v62 = vpop.xlane.xlu0 %945 }
 0x26a   :  { %v954_v63 = vadd.f32 %v1602_v61, %v946_v62 }
 0x26c   :  { %v956_v0 = vand.u32 2147483647, %v954_v63  ;;  %v955_v11 = vmax.f32 %v954_v63, 0.0  ;;  %v1604_v63 = vld [vmem:[%s2472_s14] ss:$0 sm:$0xff] }
 0x26e   :  { %v957_v1 = vsub.f32 0.0, %v956_v0 }
 0x270   :  { %v958_v2 = vmul.f32 1.442695, %v957_v1 }
 0x272   :  { %1872 = vpow2.f32 %v958_v2 }
 0x27f   :  { %v1873_v3 = vpop.eup %1872 }
 0x280   :  { %v960_v4 = vadd.f32 1.0, %v1873_v3  ;;  %v963_v5 = vmul.f32 -0.5, %v1873_v3  ;;  %v966_v7 = vand.u32 2147483647, %v1873_v3 }
 0x282   :  { %1874 = vlog2.f32 %v960_v4  ;;  %v964_v6 = vadd.f32 1.0, %v963_v5  ;;  %vm967_vm2 = vcmp.lt.f32.partialorder %v966_v7, 0.0004427343  ;;  %v2294_v5 = vld [vmem:[%s2473_s13] ss:$0 sm:$0xff] }
 0x284   :  { %v965_v10 = vmul.f32 %v1873_v3, %v964_v6 }
 0x28f   :  { %v1875_v8 = vpop.eup %1874 }
 0x290   :  { %v962_v9 = vmul.f32 0.6931472, %v1875_v8 }
 0x292   :  { %v968_v12 = vsel %vm967_vm2, %v965_v10, %v962_v9 }
 0x293   :  { %v969_v13 = vadd.f32 %v968_v12, %v955_v11 }
 0x295   :  { %v970_v14 = vadd.f32 1.0, %v969_v13 }
 0x297   :  { %v971_v15 = vmul.f32 4.0, %v970_v14  ;;  %v981_v21 = vmul.f32 2.0, %v970_v14 }
 0x299   :  { %v972_v17 = vmul.f32 %v971_v15, %v970_v14  ;;  %v984_v26 = vadd.f32 7.0, %v981_v21 }
 0x29b   :  { %v973_v18 = vadd.f32 49.0, %v972_v17 }
 0x29d   :  { %1876 = vrsqrt.f32 %v973_v18  ;;  %v926_v19 = vpop.f32.mrf.mxu1  ;;  %vm976_vm3 = vcmp.eq.f32.partialorder %v973_v18, inf  ;;  %v979_v24 = vand.u32 2147483648, %v973_v18  ;;  %vm978_vm4 = vcmp.eq.f32.partialorder %v973_v18, 0.0 }
 0x29e   :  { %v927_v42 = vadd.f32 %v1599_v41, %v926_v19  ;;  %v1125_v41 = vld [vmem:[%s2474_s9 + $0x50] sm:$0xff] }
 0x29f   :  { %v1767_v20 = vpop.f32.mrf.mxu1 }
 0x2a0   :  { %v930_v43 = vmul.f32 %v927_v42, %v927_v42 }
 0x2aa   :  { %v1877_v22 = vpop.eup %1876 }
 0x2ab   :  { %v975_v23 = vmul.f32 %v1877_v22, %v973_v18 }
 0x2ad   :  { %v977_v25 = vsel %vm976_vm3, %v973_v18, %v975_v23 }
 0x2ae   :  { %v980_v27 = vsel %vm978_vm4, %v979_v24, %v977_v25 }
 0x2af   :  { %v982_v28 = vsub.f32 %v980_v27, %v981_v21  ;;  %v985_v29 = vadd.f32 %v984_v26, %v980_v27 }
 0x2b1   :  { %v983_v30 = vmul.f32 0.14285715, %v982_v28  ;;  %v986_v31 = vmul.f32 0.25, %v985_v29 }
 0x2b3   :  { %v995_v32 = vsub.f32 1.0, %v983_v30  ;;  %v989_v33 = vadd.f32 1.0, %v983_v30  ;;  %v1012_v34 = vmul.f32 2.0, %v986_v31  ;;  %v987_v36 = vmul.f32 4.0, %v986_v31 }
 0x2b5   :  { %998 = vperm.xlu0 %1806, %v995_v32   ;;  %v1013_v35 = vmul.f32 %v1012_v34, %v983_v30  ;;  %1878 = vrcp.f32 %v989_v33  ;;  %v988_v37 = vmul.f32 %v987_v36, %v983_v30  ;;  %v1130_v36 = vld [vmem:[%s2474_s9 + $0x78] sm:$0xff] }
 0x2b6   :  { %1769 = vmatpush3.msra.mxu0 %v1130_v36  ;;  %v1221_v36 = vld [vmem:[%s2475_s11 + $0x58] sm:$0xff] }
 0x2b7   :  { %1016 = vperm.xlu1 %1807, %v1013_v35   ;;  %1770 = vmatprep.subr.mxu0 %v1894_v16 }
 0x2c2   :  { %v1879_v38 = vpop.eup %1878 }
 0x2c3   :  { %v991_v39 = vmul.f32 %v1879_v38, %v988_v37  ;;  %v1129_v37 = vld [vmem:[%s2474_s9 + $0x70] sm:$0xff]  ;;  %v1128_v38 = vld [vmem:[%s2474_s9 + $0x68] sm:$0xff] }
 0x2c4   :  { %1771 = vmatpush3.msra.mxu0 %v1129_v37  ;;  %v1225_v37 = vld [vmem:[%s2475_s11 + $0x78] sm:$0xff] }
 0x2c5   :  { %v1603_v40 = vadd.f32 -13.62137, %v991_v39  ;;  %1772 = vmatprep.subr.mxu0 %v1894_v16  ;;  %v1127_v39 = vld [vmem:[%s2474_s9 + $0x60] sm:$0xff] }
 0x2c6   :  { %1773 = vmatpush3.msra.mxu0 %v1128_v38 }
 0x2c7   :  { %1026 = vperm.xlu1 %1807, %v1603_v40   ;;  %1774 = vmatprep.subr.mxu0 %v1894_v16  ;;  %v1126_v40 = vld [vmem:[%s2474_s9 + $0x58] sm:$0xff] }
 0x2c8   :  { %1775 = vmatpush3.msra.mxu0 %v1127_v39  ;;  %v1626_v39 = vcombine.high %v1221_v36, %v1225_v37 }
 0x2c9   :  { %1776 = vmatprep.subr.mxu0 %v1894_v16 }
 0x2ca   :  { %1777 = vmatpush3.msra.mxu0 %v1126_v40  ;;  %v1213_v40 = vld [vmem:[%s2475_s11 + $0x18] sm:$0xff] }
 0x2cb   :  { %1778 = vmatprep.subr.mxu0 %v1894_v16 }
 0x2cc   :  { %1779 = vmatpush3.msra.mxu0 %v1125_v41  ;;  %v1217_v41 = vld [vmem:[%s2475_s11 + $0x38] sm:$0xff] }
 0x2cd   :  { %1780 = vmatprep.subr.mxu0 %v1894_v16 }
 0x2d4   :  { %931 = vadd.xlane.f32.xlu0 %v930_v43  ;;  %v1123_v43 = vld [vmem:[%s2474_s9 + $0x40] sm:$0xff] }
 0x2d8   :  { %1067 = vadd.xlane.f32.xlu0 %v1066_v45  ;;  %v1122_v45 = vld [vmem:[%s2474_s9 + $0x38] sm:$0xff] }
 0x330   :  { %v999_v47 = vpop.permute.xlu0 %998 }
 0x331   :  { %v1001_v48 = vmul.f32 %v999_v47, %v993_v46  ;;  %v1120_v47 = vld [vmem:[%s2474_s9 + $0x28] sm:$0xff] }
 0x332   :  { %v1017_v51 = vpop.permute.xlu1 %1016 }
 0x333   :  { %v1002_v49 = vsub.f32 1.0, %v1001_v48  ;;  %v1119_v48 = vld [vmem:[%s2474_s9 + $0x20] sm:$0xff] }
 0x335   :  { %1880 = vrcp.f32 %v1002_v49  ;;  %v1118_v49 = vld [vmem:[%s2474_s9 + $0x18] sm:$0xff] }
 0x342   :  { %v1881_v50 = vpop.eup %1880  ;;  %v1027_v61 = vpop.permute.xlu1 %1026 }
 0x343   :  { %v1019_v52 = vmul.f32 %v1881_v50, %v1017_v51 }
 0x345   :  { %1882 = vlog2.f32 %v1019_v52 }
 0x346   :  { %1884 = vlog2.f32 %v994_v53 }
 0x352   :  { %v1883_v54 = vpop.eup %1882 }
 0x353   :  { %v1021_v55 = vmul.f32 0.6931472, %v1883_v54  ;;  %v1885_v56 = vpop.eup %1884 }
 0x354   :  { %v1031_v59 = vmul.f32 0.6931472, %v1885_v56 }
 0x355   :  { %v1022_v57 = vmul.f32 7.0, %v1021_v55 }
 0x357   :  { %v1023_v58 = vsub.f32 %v1022_v57, %v1019_v52 }
 0x359   :  { %v1029_v62 = vadd.f32 %v1027_v61, %v1023_v58 }
 0x35b   :  { %vm1032_vm6 = vcmp.ge.f32.partialorder %v1029_v62, %v1031_v59 }
 0x35c   :  { %v1040_v0 = vsel %vm1032_vm6, %v1604_v63, 16.0  ;;  %v1606_v15 = vsel %vm1032_vm6, 1.0, %v1894_v16 }
 0x35d   :  { %v932_v1 = vpop.xlane.xlu0 %931  ;;  %v1042_v2 = vsel %vm1041_vm5, %v1040_v0, inf }
 0x35e   :  { %v933_v3 = vadd.f32 1e-12, %v932_v1  ;;  %1043 = vmin.xlane.f32.xlu1 %v1042_v2  ;;  %v1117_v1 = vld [vmem:[%s2474_s9 + $0x10] sm:$0xff]  ;;  %v1115_v2 = vld [vmem:[%s2474_s9] sm:$0xff] }
 0x360   :  { %1886 = vrsqrt.f32 %v933_v3  ;;  %v1218_v3 = vld [vmem:[%s2475_s11 + $0x40] sm:$0xff] }
 0x36d   :  { %v1887_v4 = vpop.eup %1886 }
 0x36e   :  { %v935_v6 = vmul.f32 %v1887_v4, %v927_v42  ;;  %v1124_v42 = vld [vmem:[%s2474_s9 + $0x48] sm:$0xff]  ;;  %v1222_v4 = vld [vmem:[%s2475_s11 + $0x60] sm:$0xff] }
 0x36f   :  { %1006 = vperm.xlu1 %1807, %v989_v33   ;;  %1781 = vmatpush3.msra.mxu0 %v1124_v42  ;;  %v1625_v42 = vcombine.low %v1221_v36, %v1225_v37 }
 0x370   :  { %v2297_v7 = vsub.f32 %v2294_v5, %v935_v6  ;;  %1782 = vmatprep.subr.mxu0 %v1894_v16  ;;  %v1620_v6 = vcombine.high %v1218_v3, %v1222_v4 }
 0x371   :  { %1783 = vmatpush3.msra.mxu0 %v1123_v43  ;;  %v1618_v43 = vcombine.high %v1213_v40, %v1217_v41 }
 0x372   :  { %v1103_v8 = vmul.f32 %v2297_v7, %v2297_v7  ;;  %1784 = vmatprep.subr.mxu0 %v1894_v16  ;;  %1363 = vmatprep.subr.bf16.mxu1 %v1620_v6 }
 0x373   :  { %1785 = vmatpush3.msra.mxu0 %v1122_v45  ;;  %v1617_v45 = vcombine.low %v1213_v40, %v1217_v41 }
 0x374   :  { %1104 = vadd.xlane.f32.xlu0 %v1103_v8  ;;  %1786 = vmatprep.subr.mxu0 %v1894_v16 }
 0x3e7   :  { %v1044_v9 = vpop.xlane.xlu1 %1043 }
 0x3e8   :  { %vm1045_vm7 = vcmp.eq.f32.partialorder %v1040_v0, %v1044_v9  ;;  %vm1051_vm8 = vcmp.lt.f32.partialorder %v1044_v9, 16.0 }
 0x3e9   :  { %v1605_v12 = vsel %vm1045_vm7, 1.0, %v1894_v16  ;;  %v1607_v13 = vsel %vm1051_vm8, 1.0, %v1894_v16 }
 0x3ea   :  { %v1050_v17 = vmul.f32 %v1606_v15, %v1605_v12  ;;  %v1059_v19 = vsub.f32 1.0, %v1607_v13  ;;  %v1223_v15 = vld [vmem:[%s2475_s11 + $0x68] sm:$0xff] }
 0x3eb   :  { %v1007_v10 = vpop.permute.xlu1 %1006 }
 0x3ec   :  { %v1009_v11 = vmul.f32 %v1007_v10, %v993_v46  ;;  %v1121_v46 = vld [vmem:[%s2474_s9 + $0x30] sm:$0xff]  ;;  %v1210_v10 = vld [vmem:[%s2475_s11] sm:$0xff] }
 0x3ed   :  { %1787 = vmatpush3.msra.mxu0 %v1121_v46  ;;  %v1228_v46 = vlaneseq }
 0x3ee   :  { %v1010_v14 = vsub.f32 1.0, %v1009_v11  ;;  %1788 = vmatprep.subr.mxu0 %v1894_v16  ;;  %v1214_v11 = vld [vmem:[%s2475_s11 + $0x20] sm:$0xff] }
 0x3ef   :  { %1789 = vmatpush3.msra.mxu0 %v1120_v47  ;;  %v1612_v12 = vcombine.high %v1210_v10, %v1214_v11  ;;  %v1229_v47 = vshrl.u32 %v1228_v46, 7 }
 0x3f0   :  { %v1011_v18 = vmul.f32 %v1881_v50, %v1010_v14  ;;  %1790 = vmatprep.subr.mxu0 %v1894_v16  ;;  %v1068_v50 = vpop.xlane.xlu0 %1067  ;;  %v1219_v14 = vld [vmem:[%s2475_s11 + $0x48] sm:$0xff] }
 0x3f1   :  { %1791 = vmatpush3.msra.mxu0 %v1119_v48  ;;  %v1069_v51 = vadd.f32 1e-12, %v1068_v50  ;;  %v1230_v48 = vsub.s32 0, %v1229_v47  ;;  %v1234_v50 = vsub.s32 1, %v1229_v47 }
 0x3f2   :  { %v1054_v20 = vmul.f32 %v1050_v17, %v1011_v18  ;;  %v1060_v21 = vmul.f32 %v1059_v19, %v1011_v18  ;;  %1792 = vmatprep.subr.mxu0 %v1894_v16  ;;  %v1621_v17 = vcombine.low %v1219_v14, %v1223_v15  ;;  %v1622_v18 = vcombine.high %v1219_v14, %v1223_v15  ;;  %v1610_v19 = vld [vmem:[%s2477_s10] ss:$0 sm:$0xff] }
 0x3f3   :  { %1793 = vmatpush3.msra.mxu0 %v1118_v49  ;;  %v1226_v49 = vld [vmem:[%s2478_s12] sm:$0xff] }
 0x3f4   :  { %v1055_v22 = vsel %vm1041_vm5, %v1054_v20, 0.0  ;;  %1794 = vmatprep.subr.mxu0 %v1894_v16 }
 0x3f5   :  { %1056 = vadd.xlane.f32.xlu1 %v1055_v22  ;;  %1795 = vmatpush3.msra.mxu0 %v1117_v1  ;;  %v1246_v1 = vsub.s32 4, %v1229_v47 }
 0x3f6   :  { %1796 = vmatprep.subr.mxu0 %v1894_v16 }
 0x3fd   :  { %v1105_v52 = vpop.xlane.xlu0 %1104 }
 0x3fe   :  { %v1106_v53 = vadd.f32 1e-12, %v1105_v52  ;;  %v1235_v52 = vrot.slane %v1226_v49, %v1234_v50 }
 0x47e   :  { %v1057_v23 = vpop.xlane.xlu1 %1056 }
 0x47f   :  { %v1058_v24 = vmul.f32 %v1607_v13, %v1057_v23  ;;  %v1611_v13 = vcombine.low %v1210_v10, %v1214_v11  ;;  %v1211_v23 = vld [vmem:[%s2475_s11 + $0x8] sm:$0xff] }
 0x481   :  { %v1061_v25 = vadd.f32 %v1060_v21, %v1058_v24  ;;  %v1215_v24 = vld [vmem:[%s2475_s11 + $0x28] sm:$0xff] }
 0x483   :  { %v1608_v26 = vclamps-f32 %v1061_v25, 1.0 }
 0x485   :  { %v1072_v27 = vsub.f32 1.0, %v1608_v26  ;;  %v1073_v28 = vadd.f32 1.0, %v1608_v26  ;;  %1085 = vperm.xlu0 %1806, %v1608_v26  }
 0x487   :  { %v1074_v29 = vmul.f32 %v1073_v28, %v1072_v27  ;;  %v1614_v27 = vcombine.high %v1211_v23, %v1215_v24  ;;  %v1220_v28 = vld [vmem:[%s2475_s11 + $0x50] sm:$0xff] }
 0x489   :  { %v1075_v30 = vmax.f32 %v1074_v29, 0.0  ;;  %v1224_v29 = vld [vmem:[%s2475_s11 + $0x70] sm:$0xff] }
 0x48b   :  { %1888 = vrsqrt.f32 %v1075_v30  ;;  %vm1078_vm9 = vcmp.eq.f32.partialorder %v1075_v30, inf  ;;  %v1081_v33 = vand.u32 2147483648, %v1075_v30  ;;  %vm1080_vm10 = vcmp.eq.f32.partialorder %v1075_v30, 0.0 }
 0x48c   :  { %1890 = vrsqrt.f32 %v1069_v51  ;;  %v1231_v51 = vrot.slane %v1226_v49, %v1230_v48 }
 0x48d   :  { %1892 = vrsqrt.f32 %v1106_v53 }
 0x498   :  { %v1889_v31 = vpop.eup %1888 }
 0x499   :  { %v1077_v32 = vmul.f32 %v1889_v31, %v1075_v30  ;;  %v1891_v54 = vpop.eup %1890  ;;  %v1624_v31 = vcombine.high %v1220_v28, %v1224_v29 }
 0x49a   :  { %v1071_v55 = vmul.f32 %v1891_v54, %v2276_v44  ;;  %v1893_v57 = vpop.eup %1892  ;;  %v1116_v44 = vld [vmem:[%s2474_s9 + $0x8] sm:$0xff] }
 0x49b   :  { %v1079_v34 = vsel %vm1078_vm9, %v1075_v30, %v1077_v32  ;;  %v1108_v63 = vmul.f32 %v1893_v57, %v2297_v7  ;;  %1797 = vmatpush3.msra.mxu0 %v1116_v44  ;;  %v1613_v30 = vcombine.low %v1211_v23, %v1215_v24  ;;  %v1212_v32 = vld [vmem:[%s2475_s11 + $0x10] sm:$0xff]  ;;  %v1242_v57 = vsub.s32 3, %v1229_v47 }
 0x49c   :  { %v1082_v35 = vsel %vm1080_vm10, %v1081_v33, %v1079_v34  ;;  %1798 = vmatprep.subr.mxu0 %v1894_v16  ;;  %v1216_v33 = vld [vmem:[%s2475_s11 + $0x30] sm:$0xff]  ;;  %v1623_v34 = vcombine.low %v1220_v28, %v1224_v29 }
 0x49d   :  { %1097 = vperm.xlu1 %1807, %v1082_v35   ;;  %1799 = vmatpush3.msra.mxu0 %v1115_v2  ;;  %v1616_v35 = vcombine.high %v1212_v32, %v1216_v33  ;;  %v1615_v38 = vcombine.low %v1212_v32, %v1216_v33 }
 0x500   :  { %v1086_v56 = vpop.permute.xlu0 %1085 }
 0x501   :  { %v1094_v59 = vmul.f32 %v2294_v5, %v1086_v56  ;;  %v1619_v5 = vcombine.low %v1218_v3, %v1222_v4  ;;  %v1250_v3 = vsub.s32 5, %v1229_v47 }
 0x503   :  { %1364 = vmatpush1.bf16.msra.mxu1 %v1619_v5  ;;  %v1247_v5 = vrot.slane %v1226_v49, %v1246_v1 }
 0x504   :  { %1365 = vmatprep.subr.bf16.mxu1 %v1612_v12  ;;  %v1258_v12 = vsub.s32 7, %v1229_v47 }
 0x507   :  { %1366 = vmatpush1.bf16.msra.mxu1 %v1611_v13 }
 0x508   :  { %1404 = vmatprep.subr.bf16.mxu1 %v1622_v18 }
 0x518   :  { %v1098_v58 = vpop.permute.xlu1 %1097 }
 0x519   :  { %v1100_v61 = vmul.f32 %v1098_v58, %v1071_v55  ;;  %v1238_v55 = vsub.s32 2, %v1229_v47 }
 0x51b   :  { %v1101_v62 = vadd.f32 %v1100_v61, %v1094_v59  ;;  %v1239_v59 = vrot.slane %v1226_v49, %v1238_v55 }
 0x51d   :  { %v1109_v0 = vmul.f32 %v1108_v63, %v1101_v62 }
 0x51f   :  { %1110 = vadd.xlane.f32.xlu0 %v1109_v0 }
 0x5a8   :  { %v1111_v7 = vpop.xlane.xlu0 %1110 }
 0x5a9   :  { %v1112_v8 = vmul.f32 2.0, %v1111_v7  ;;  %v1251_v7 = vrot.slane %v1226_v49, %v1250_v3 }
 0x5ab   :  { %v1113_v16 = vmul.f32 %v1112_v8, %v1108_v63 }
 0x5ad   :  { %v1114_v9 = vsub.f32 %v1101_v62, %v1113_v16  ;;  %v1243_v62 = vrot.slane %v1226_v49, %v1242_v57 }
 0x5af   :  { %1523 = vst [vmem:[%s2476_s19] sm:$0xff] %v1114_v9  ;;  %1801 = vmatmul.mubr.f32.vlgmr.msra.gmra.mxu0 %v1114_v9  ;;  %v1254_v9 = vsub.s32 6, %v1229_v47 }
 0x5b1   :  { %v1255_v14 = vrot.slane %v1226_v49, %v1254_v9 }
 0x66f   :  { %v1204_v20 = vpop.f32.mrf.mxu0 }
 0x670   :  { %v1205_v21 = vadd.f32 %v1610_v19, %v1204_v20 }
 0x671   :  { %v1802_v22 = vpop.f32.mrf.mxu0 }
 0x672   :  { %v1208_v25 = vmax.f32 %v1205_v21, 0.0 }
 0x674   :  { %v1209_v26 = vpack.c.bf16 %v1208_v25, %v1208_v25 }
 0x676   :  { %1627 = vmatmul.mubr.msk.bf16.vlgmr.msra.gmra.mxu1 %vm771_vm1, %v1209_v26 }
 0x677   :  { %1405 = vmatpush1.bf16.msra.mxu1 %v1621_v17  ;;  %1424 = vmatprep.mubr.bf16.mxu1 %v1896_v60  ;;  %v1259_v17 = vrot.slane %v1226_v49, %v1258_v12 }
 0x678   :  { %1406 = vmatprep.subr.bf16.mxu1 %v1614_v27 }
 0x67b   :  { %1407 = vmatpush1.bf16.msra.mxu1 %v1613_v30 }
 0x67c   :  { %1445 = vmatprep.subr.bf16.mxu1 %v1624_v31 }
 0x67e   :  { %1628 = vmatmul.mubr.msk.bf16.vlgmr.msra.gmra.mxu1 %vm771_vm1, %v1209_v26 }
 0x67f   :  { %1446 = vmatpush1.bf16.msra.mxu1 %v1623_v34  ;;  %1465 = vmatprep.mubr.bf16.mxu1 %v1896_v60 }
 0x680   :  { %1447 = vmatprep.subr.bf16.mxu1 %v1616_v35 }
 0x683   :  { %1448 = vmatpush1.bf16.msra.mxu1 %v1615_v38 }
 0x684   :  { %1486 = vmatprep.subr.bf16.mxu1 %v1626_v39 }
 0x686   :  { %1629 = vmatmul.mubr.msk.bf16.vlgmr.msra.gmra.mxu1 %vm771_vm1, %v1209_v26 }
 0x687   :  { %1487 = vmatpush1.bf16.msra.mxu1 %v1625_v42  ;;  %1506 = vmatprep.mubr.bf16.mxu1 %v1896_v60 }
 0x688   :  { %1488 = vmatprep.subr.bf16.mxu1 %v1618_v43 }
 0x68b   :  { %1489 = vmatpush1.bf16.msra.mxu1 %v1617_v45 }
 0x68e   :  { %1630 = vmatmul.mubr.msk.bf16.vlgmr.msra.gmra.mxu1 %vm771_vm1, %v1209_v26 }
 0x736   :  { %v1385_v53 = vpop.f32.mrf.mxu1 }
 0x737   :  { %v1386_v54 = vadd.f32 %v1385_v53, %v1231_v51 }
 0x738   :  { %v1387_v56 = vpop.f32.mrf.mxu1 }
 0x739   :  { %1515 = vst [vmem:[%s2479_s18] sm:$0xff] %v1386_v54  ;;  %v1388_v60 = vadd.f32 %v1387_v56, %v1235_v52 }
 0x73a   :  { %v1389_v58 = vpop.f32.mrf.mxu1 }
 0x73b   :  { %1516 = vst [vmem:[%s2479_s18 + $0x8] sm:$0xff] %v1388_v60 }
 0x73c   :  { %v1390_v61 = vpop.f32.mrf.mxu1 }
 0x73e   :  { %v1426_v63 = vpop.f32.mrf.mxu1 }
 0x73f   :  { %v1427_v0 = vadd.f32 %v1426_v63, %v1239_v59 }
 0x740   :  { %v1428_v44 = vpop.f32.mrf.mxu1 }
 0x741   :  { %1517 = vst [vmem:[%s2479_s18 + $0x10] sm:$0xff] %v1427_v0  ;;  %v1429_v2 = vadd.f32 %v1428_v44, %v1243_v62 }
 0x742   :  { %v1430_v4 = vpop.f32.mrf.mxu1 }
 0x743   :  { %1518 = vst [vmem:[%s2479_s18 + $0x18] sm:$0xff] %v1429_v2 }
 0x744   :  { %v1431_v6 = vpop.f32.mrf.mxu1 }
 0x746   :  { %v1467_v8 = vpop.f32.mrf.mxu1 }
 0x747   :  { %v1468_v16 = vadd.f32 %v1467_v8, %v1247_v5 }
 0x748   :  { %v1469_v10 = vpop.f32.mrf.mxu1 }
 0x749   :  { %1519 = vst [vmem:[%s2479_s18 + $0x20] sm:$0xff] %v1468_v16  ;;  %v1470_v11 = vadd.f32 %v1469_v10, %v1251_v7 }
 0x74a   :  { %v1471_v13 = vpop.f32.mrf.mxu1 }
 0x74b   :  { %1520 = vst [vmem:[%s2479_s18 + $0x28] sm:$0xff] %v1470_v11 }
 0x74c   :  { %v1472_v15 = vpop.f32.mrf.mxu1 }
 0x74e   :  { %v1508_v18 = vpop.f32.mrf.mxu1 }
 0x74f   :  { %v1509_v19 = vadd.f32 %v1508_v18, %v1255_v14 }
 0x750   :  { %v1510_v20 = vpop.f32.mrf.mxu1 }
 0x751   :  { %1521 = vst [vmem:[%s2479_s18 + $0x30] sm:$0xff] %v1509_v19  ;;  %v1511_v21 = vadd.f32 %v1510_v20, %v1259_v17 }
 0x752   :  { %v1512_v22 = vpop.f32.mrf.mxu1 }
 0x753   :  { %1522 = vst [vmem:[%s2479_s18 + $0x38] sm:$0xff] %v1511_v21 }
 0x754   :  { %v1513_v23 = vpop.f32.mrf.mxu1 }

</bundles_post_ra>
